<compile_context>
chip_gen: v6e
topology: v6e:2x2x1
jax: 0.10.0
libtpu: 0.0.40
codegen_flags: <defaults>
</compile_context>

<pallas_src>
import jax
import jax.numpy as jnp
from jax.experimental import pallas as pl
from jax.experimental.pallas import tpu as pltpu


def _gamma_beta_kernel(x_ref, w1_ref, w2_ref, wg_ref, wb_ref,
                       gamma_ref, beta_ref):
    # x_ref : (N, F)   flattened input, F = C*resl*resl  (lane-dense)
    # w1_ref: (F, C)   fc[0] weight, pre-transposed to (in, out)
    # w2_ref/wg_ref/wb_ref: (C, C) pre-transposed
    # gamma_ref/beta_ref: (N, C)
    x = x_ref[...]
    h = jnp.maximum(
        jnp.dot(x, w1_ref[...], preferred_element_type=jnp.float32), 0.0)
    h = jnp.maximum(
        jnp.dot(h, w2_ref[...], preferred_element_type=jnp.float32), 0.0)
    gamma_ref[...] = jnp.dot(
        h, wg_ref[...], preferred_element_type=jnp.float32
    ).astype(gamma_ref.dtype)
    beta_ref[...] = jnp.dot(
        h, wb_ref[...], preferred_element_type=jnp.float32
    ).astype(beta_ref.dtype)


def gamma_beta_pallas(x, w1, w2, wg, wb):
    """GammaBeta forward.

    x  : (N, C, resl, resl)   activations (PyTorch NCHW).
    w1 : (C, C*resl*resl)     fc[0] weight (PyTorch (out, in) layout).
    w2, wg, wb : (C, C)       fc[2] / gamma / beta weights.
    Returns (gamma, beta), each (N, C).
    """
    N = x.shape[0]
    C = w1.shape[0]
    F = x.shape[1] * x.shape[2] * x.shape[3]
    assert w1.shape == (C, F), "fc[0] weight shape mismatch"
    assert w2.shape == wg.shape == wb.shape == (C, C)

    # x.view(N, -1): contiguous reshape, no data movement.
    x_flat = x.reshape(N, F)
    # Pre-transpose the (tiny, parameter-sized) weights once so the kernel
    # never does an in-kernel transpose/relayout.
    w1_t = jnp.transpose(w1)   # (F, C)
    w2_t = jnp.transpose(w2)   # (C, C)
    wg_t = jnp.transpose(wg)
    wb_t = jnp.transpose(wb)

    flops = 2 * N * (F * C + 3 * C * C)
    bytes_accessed = 4 * (N * F + F * C + 3 * C * C + 2 * N * C)

    gamma, beta = pl.pallas_call(
        _gamma_beta_kernel,
        out_shape=(jax.ShapeDtypeStruct((N, C), x.dtype),
                   jax.ShapeDtypeStruct((N, C), x.dtype)),
        grid_spec=pltpu.PrefetchScalarGridSpec(
            num_scalar_prefetch=0,
            grid=(1,),  # whole problem in one fat step; it all fits VMEM
            in_specs=[
                pl.BlockSpec((N, F), lambda i: (0, 0)),
                pl.BlockSpec((F, C), lambda i: (0, 0)),
                pl.BlockSpec((C, C), lambda i: (0, 0)),
                pl.BlockSpec((C, C), lambda i: (0, 0)),
                pl.BlockSpec((C, C), lambda i: (0, 0)),
            ],
            out_specs=(
                pl.BlockSpec((N, C), lambda i: (0, 0)),
                pl.BlockSpec((N, C), lambda i: (0, 0)),
            ),
        ),
        compiler_params=pltpu.CompilerParams(
            dimension_semantics=("arbitrary",)),
        cost_estimate=pl.CostEstimate(
            flops=flops, transcendentals=0, bytes_accessed=bytes_accessed),
    )(x_flat, w1_t, w2_t, wg_t, wb_t)
    return gamma, beta


if __name__ == "__main__":
    # Small shapes consistent with the module: channels=4, resl=16, batch=2.
    N, C, RESL = 2, 4, 16
    F = C * RESL * RESL

    key = jax.random.PRNGKey(0)
    kx, k1, k2, kg, kb = jax.random.split(key, 5)
    x = jax.random.normal(kx, (N, C, RESL, RESL), dtype=jnp.float32)
    # Linear wrapper init: weight.data.normal_(0.0, 1.0); all bias=False.
    w1 = jax.random.normal(k1, (C, F), dtype=jnp.float32)   # fc[0]
    w2 = jax.random.normal(k2, (C, C), dtype=jnp.float32)   # fc[2]
    wg = jax.random.normal(kg, (C, C), dtype=jnp.float32)   # gamma
    wb = jax.random.normal(kb, (C, C), dtype=jnp.float32)   # beta

    gamma, beta = gamma_beta_pallas(x, w1, w2, wg, wb)
    gamma, beta = jax.block_until_ready((gamma, beta))

    # Pure-JAX reference (same math as the PyTorch forward).
    hp = jax.lax.Precision.HIGHEST
    xf = x.reshape(N, F)
    h_ref = jnp.maximum(jnp.dot(xf, w1.T, precision=hp), 0.0)
    h_ref = jnp.maximum(jnp.dot(h_ref, w2.T, precision=hp), 0.0)
    g_ref = jnp.dot(h_ref, wg.T, precision=hp)
    b_ref = jnp.dot(h_ref, wb.T, precision=hp)

    assert gamma.shape == (N, C) and beta.shape == (N, C)
    assert jnp.allclose(gamma, g_ref, rtol=5e-3, atol=5e-3), "gamma mismatch"
    assert jnp.allclose(beta, b_ref, rtol=5e-3, atol=5e-3), "beta mismatch"

    print("KERNEL_OK")
</pallas_src>

<mosaic_0001>
module attributes {stable_mosaic.version = 11 : i64} {
  func.func @_gamma_beta_kernel(%arg0: i32, %arg1: memref<2x1024xf32, #tpu.memory_space<vmem>>, %arg2: memref<1024x4xf32, #tpu.memory_space<vmem>>, %arg3: memref<4x4xf32, #tpu.memory_space<vmem>>, %arg4: memref<4x4xf32, #tpu.memory_space<vmem>>, %arg5: memref<4x4xf32, #tpu.memory_space<vmem>>, %arg6: memref<2x4xf32, #tpu.memory_space<vmem>>, %arg7: memref<2x4xf32, #tpu.memory_space<vmem>>) attributes {dimension_semantics = [#tpu.dimension_semantics<arbitrary>], iteration_bounds = array<i64: 1>, scalar_prefetch = 0 : i64, scratch_operands = 0 : i64, tpu.core_type = #tpu.core_type<tc>, window_params = [{pipeline_mode = #tpu.pipeline_mode<synchronous>, transform_indices = @transform_0, window_bounds = array<i64: 2, 1024>}, {pipeline_mode = #tpu.pipeline_mode<synchronous>, transform_indices = @transform_1, window_bounds = array<i64: 1024, 4>}, {pipeline_mode = #tpu.pipeline_mode<synchronous>, transform_indices = @transform_2, window_bounds = array<i64: 4, 4>}, {pipeline_mode = #tpu.pipeline_mode<synchronous>, transform_indices = @transform_3, window_bounds = array<i64: 4, 4>}, {pipeline_mode = #tpu.pipeline_mode<synchronous>, transform_indices = @transform_4, window_bounds = array<i64: 4, 4>}, {pipeline_mode = #tpu.pipeline_mode<synchronous>, transform_indices = @transform_5, window_bounds = array<i64: 2, 4>}, {pipeline_mode = #tpu.pipeline_mode<synchronous>, transform_indices = @transform_6, window_bounds = array<i64: 2, 4>}]} {
    %c0 = arith.constant 0 : index
    %c0_0 = arith.constant 0 : index
    %0 = vector.load %arg1[%c0, %c0_0] : memref<2x1024xf32, #tpu.memory_space<vmem>>, vector<2x1024xf32>
    %c0_1 = arith.constant 0 : index
    %c0_2 = arith.constant 0 : index
    %1 = vector.load %arg2[%c0_1, %c0_2] : memref<1024x4xf32, #tpu.memory_space<vmem>>, vector<1024x4xf32>
    %cst = arith.constant dense<0.000000e+00> : vector<2x4xf32>
    %2 = tpu.matmul %0, %1, %cst {dimension_numbers = #tpu.dot_dimension_numbers<[1], [0], [0], [1], [0, 0, 1, 1], [], []>} : vector<2x1024xf32>, vector<1024x4xf32>, vector<2x4xf32> -> vector<2x4xf32>
    %cst_3 = arith.constant 0.000000e+00 : f32
    %3 = vector.broadcast %cst_3 : f32 to vector<2x4xf32>
    %4 = arith.maximumf %2, %3 : vector<2x4xf32>
    %c0_4 = arith.constant 0 : index
    %c0_5 = arith.constant 0 : index
    %5 = vector.load %arg3[%c0_4, %c0_5] : memref<4x4xf32, #tpu.memory_space<vmem>>, vector<4x4xf32>
    %cst_6 = arith.constant dense<0.000000e+00> : vector<2x4xf32>
    %6 = tpu.matmul %4, %5, %cst_6 {dimension_numbers = #tpu.dot_dimension_numbers<[1], [0], [0], [1], [0, 0, 1, 1], [], []>} : vector<2x4xf32>, vector<4x4xf32>, vector<2x4xf32> -> vector<2x4xf32>
    %cst_7 = arith.constant 0.000000e+00 : f32
    %7 = vector.broadcast %cst_7 : f32 to vector<2x4xf32>
    %8 = arith.maximumf %6, %7 : vector<2x4xf32>
    %c0_8 = arith.constant 0 : index
    %c0_9 = arith.constant 0 : index
    %9 = vector.load %arg4[%c0_8, %c0_9] : memref<4x4xf32, #tpu.memory_space<vmem>>, vector<4x4xf32>
    %cst_10 = arith.constant dense<0.000000e+00> : vector<2x4xf32>
    %10 = tpu.matmul %8, %9, %cst_10 {dimension_numbers = #tpu.dot_dimension_numbers<[1], [0], [0], [1], [0, 0, 1, 1], [], []>} : vector<2x4xf32>, vector<4x4xf32>, vector<2x4xf32> -> vector<2x4xf32>
    %c0_11 = arith.constant 0 : index
    %c0_12 = arith.constant 0 : index
    %11 = vector.load %arg6[%c0_11, %c0_12] : memref<2x4xf32, #tpu.memory_space<vmem>>, vector<2x4xf32>
    tpu.vector_store %arg6[%c0_11, %c0_12], %10 {strides = array<i32>} : memref<2x4xf32, #tpu.memory_space<vmem>>, vector<2x4xf32>,
    %c0_13 = arith.constant 0 : index
    %c0_14 = arith.constant 0 : index
    %12 = vector.load %arg5[%c0_13, %c0_14] : memref<4x4xf32, #tpu.memory_space<vmem>>, vector<4x4xf32>
    %cst_15 = arith.constant dense<0.000000e+00> : vector<2x4xf32>
    %13 = tpu.matmul %8, %12, %cst_15 {dimension_numbers = #tpu.dot_dimension_numbers<[1], [0], [0], [1], [0, 0, 1, 1], [], []>} : vector<2x4xf32>, vector<4x4xf32>, vector<2x4xf32> -> vector<2x4xf32>
    %c0_16 = arith.constant 0 : index
    %c0_17 = arith.constant 0 : index
    %14 = vector.load %arg7[%c0_16, %c0_17] : memref<2x4xf32, #tpu.memory_space<vmem>>, vector<2x4xf32>
    tpu.vector_store %arg7[%c0_16, %c0_17], %13 {strides = array<i32>} : memref<2x4xf32, #tpu.memory_space<vmem>>, vector<2x4xf32>,
    return
  }
  func.func @transform_0(%arg0: i32) -> (i32, i32) {
    %c0_i32 = arith.constant 0 : i32
    %c0_i32_0 = arith.constant 0 : i32
    %c0_i32_1 = arith.constant 0 : i32
    return %c0_i32, %c0_i32_0 : i32, i32
  }
  func.func @transform_1(%arg0: i32) -> (i32, i32) {
    %c0_i32 = arith.constant 0 : i32
    %c0_i32_0 = arith.constant 0 : i32
    %c0_i32_1 = arith.constant 0 : i32
    return %c0_i32, %c0_i32_0 : i32, i32
  }
  func.func @transform_2(%arg0: i32) -> (i32, i32) {
    %c0_i32 = arith.constant 0 : i32
    %c0_i32_0 = arith.constant 0 : i32
    %c0_i32_1 = arith.constant 0 : i32
    return %c0_i32, %c0_i32_0 : i32, i32
  }
  func.func @transform_3(%arg0: i32) -> (i32, i32) {
    %c0_i32 = arith.constant 0 : i32
    %c0_i32_0 = arith.constant 0 : i32
    %c0_i32_1 = arith.constant 0 : i32
    return %c0_i32, %c0_i32_0 : i32, i32
  }
  func.func @transform_4(%arg0: i32) -> (i32, i32) {
    %c0_i32 = arith.constant 0 : i32
    %c0_i32_0 = arith.constant 0 : i32
    %c0_i32_1 = arith.constant 0 : i32
    return %c0_i32, %c0_i32_0 : i32, i32
  }
  func.func @transform_5(%arg0: i32) -> (i32, i32) {
    %c0_i32 = arith.constant 0 : i32
    %c0_i32_0 = arith.constant 0 : i32
    %c0_i32_1 = arith.constant 0 : i32
    return %c0_i32, %c0_i32_0 : i32, i32
  }
  func.func @transform_6(%arg0: i32) -> (i32, i32) {
    %c0_i32 = arith.constant 0 : i32
    %c0_i32_0 = arith.constant 0 : i32
    %c0_i32_1 = arith.constant 0 : i32
    return %c0_i32, %c0_i32_0 : i32, i32
  }
}

</mosaic_0001>

<bundles_post_ra>
// kernel: tpu_custom_call.1
= control target key start
LH: loop header
LB: loop body
LE: loop exit
PB: predicated region body
PF: predicated region fallthrough
CT: control target
= control target key end

     0   :  { %12 = vsyncpa [#allocation3], 0  ;;  %v959_v30 = vmov 1983009808   ;;  %v160_v32 = vlaneseq  ;;  %s1416_s0 = inlined_call_operand.vmem [shape: f32[2,1024], index: 0, kind: input, shape index: {}]   ;;  %s1417_s1 = inlined_call_operand.vmem [shape: f32[1024,4], index: 1, kind: input, shape index: {}]   ;;  %s1418_s2 = inlined_call_operand.vmem [shape: f32[4,4], index: 2, kind: input, shape index: {}]   ;;  %s1419_s3 = inlined_call_operand.vmem [shape: f32[4,4], index: 3, kind: input, shape index: {}]   ;;  %s1420_s4 = inlined_call_operand.vmem [shape: f32[4,4], index: 4, kind: input, shape index: {}]   ;;  %s1421_s5 = inlined_call_operand.hbm [shape: f32[2,4], index: 5, kind: output, shape index: {0}]   ;;  %s1422_s6 = inlined_call_operand.hbm [shape: f32[2,4], index: 6, kind: output, shape index: {1}]  }
   0x1   :  { %v57_v0 = vld [vmem:[%s1417_s1 + $0xf8] sm:$0xff]  ;;  %v56_v4 = vld [vmem:[%s1417_s1 + $0xf0] sm:$0xff]  ;;  %v55_v8 = vld [vmem:[%s1417_s1 + $0xe8] sm:$0xff]  ;;  %v158_v31 = vunpack.c.l.s4 %v959_v30 }
   0x2   :  { %v89_v1 = vld [vmem:[%s1417_s1 + $0x1f8] sm:$0xff]  ;;  %747 = vmatprep.subr.mxu0 %v57_v0  ;;  %v88_v5 = vld [vmem:[%s1417_s1 + $0x1f0] sm:$0xff]  ;;  %v87_v9 = vld [vmem:[%s1417_s1 + $0x1e8] sm:$0xff]  ;;  %v161_v42 = vshrl.u32 %v160_v32, 7 }
   0x3   :  { %v41_v2 = vld [vmem:[%s1417_s1 + $0x78] sm:$0xff]  ;;  %782 = vmatprep.subr.mxu1 %v89_v1  ;;  %v40_v6 = vld [vmem:[%s1417_s1 + $0x70] sm:$0xff]  ;;  %v39_v10 = vld [vmem:[%s1417_s1 + $0x68] sm:$0xff]  ;;  %v159_v41 = vunpack.c.0.s8 %v158_v31 }
   0x4   :  { %v73_v3 = vld [vmem:[%s1417_s1 + $0x178] sm:$0xff]  ;;  %748 = vmatpush3.msra.mxu0 %v41_v2  ;;  %v72_v7 = vld [vmem:[%s1417_s1 + $0x170] sm:$0xff]  ;;  %v71_v11 = vld [vmem:[%s1417_s1 + $0x168] sm:$0xff] }
   0x5   :  { %783 = vmatpush3.msra.mxu1 %v73_v3  ;;  %749 = vmatprep.subr.mxu0 %v56_v4  ;;  %v54_v12 = vld [vmem:[%s1417_s1 + $0xe0] sm:$0xff]  ;;  %v53_v16 = vld [vmem:[%s1417_s1 + $0xd8] sm:$0xff]  ;;  %v52_v20 = vld [vmem:[%s1417_s1 + $0xd0] sm:$0xff]  ;;  %v1137_v51 = vsub.s32 %v159_v41, %v161_v42 }
   0x6   :  { %784 = vmatprep.subr.mxu1 %v88_v5  ;;  %750 = vmatpush3.msra.mxu0 %v40_v6  ;;  %v86_v13 = vld [vmem:[%s1417_s1 + $0x1e0] sm:$0xff]  ;;  %v85_v17 = vld [vmem:[%s1417_s1 + $0x1d8] sm:$0xff]  ;;  %v84_v21 = vld [vmem:[%s1417_s1 + $0x1d0] sm:$0xff] }
   0x7   :  { %785 = vmatpush3.msra.mxu1 %v72_v7  ;;  %751 = vmatprep.subr.mxu0 %v55_v8  ;;  %v38_v14 = vld [vmem:[%s1417_s1 + $0x60] sm:$0xff]  ;;  %v37_v18 = vld [vmem:[%s1417_s1 + $0x58] sm:$0xff]  ;;  %v36_v22 = vld [vmem:[%s1417_s1 + $0x50] sm:$0xff] }
   0x8   :  { %786 = vmatprep.subr.mxu1 %v87_v9  ;;  %v70_v15 = vld [vmem:[%s1417_s1 + $0x160] sm:$0xff]  ;;  %752 = vmatpush3.msra.mxu0 %v39_v10  ;;  %v69_v19 = vld [vmem:[%s1417_s1 + $0x158] sm:$0xff]  ;;  %v68_v23 = vld [vmem:[%s1417_s1 + $0x150] sm:$0xff] }
   0x9   :  { %787 = vmatpush3.msra.mxu1 %v71_v11  ;;  %753 = vmatprep.subr.mxu0 %v54_v12  ;;  %v51_v24 = vld [vmem:[%s1417_s1 + $0xc8] sm:$0xff]  ;;  %v50_v28 = vld [vmem:[%s1417_s1 + $0xc0] sm:$0xff]  ;;  %v49_v35 = vld [vmem:[%s1417_s1 + $0xb8] sm:$0xff] }
   0xa   :  { %788 = vmatprep.subr.mxu1 %v86_v13  ;;  %754 = vmatpush3.msra.mxu0 %v38_v14  ;;  %v83_v25 = vld [vmem:[%s1417_s1 + $0x1c8] sm:$0xff]  ;;  %v82_v29 = vld [vmem:[%s1417_s1 + $0x1c0] sm:$0xff]  ;;  %v81_v36 = vld [vmem:[%s1417_s1 + $0x1b8] sm:$0xff] }
   0xb   :  { %789 = vmatpush3.msra.mxu1 %v70_v15  ;;  %755 = vmatprep.subr.mxu0 %v53_v16  ;;  %v35_v26 = vld [vmem:[%s1417_s1 + $0x48] sm:$0xff]  ;;  %v34_v33 = vld [vmem:[%s1417_s1 + $0x40] sm:$0xff]  ;;  %v33_v37 = vld [vmem:[%s1417_s1 + $0x38] sm:$0xff] }
   0xc   :  { %790 = vmatprep.subr.mxu1 %v85_v17  ;;  %756 = vmatpush3.msra.mxu0 %v37_v18  ;;  %v67_v27 = vld [vmem:[%s1417_s1 + $0x148] sm:$0xff]  ;;  %v66_v34 = vld [vmem:[%s1417_s1 + $0x140] sm:$0xff]  ;;  %v65_v38 = vld [vmem:[%s1417_s1 + $0x138] sm:$0xff] }
   0xd   :  { %791 = vmatpush3.msra.mxu1 %v69_v19  ;;  %757 = vmatprep.subr.mxu0 %v52_v20  ;;  %v48_v39 = vld [vmem:[%s1417_s1 + $0xb0] sm:$0xff]  ;;  %v47_v45 = vld [vmem:[%s1417_s1 + $0xa8] sm:$0xff]  ;;  %v46_v49 = vld [vmem:[%s1417_s1 + $0xa0] sm:$0xff] }
   0xe   :  { %792 = vmatprep.subr.mxu1 %v84_v21  ;;  %758 = vmatpush3.msra.mxu0 %v36_v22  ;;  %v80_v40 = vld [vmem:[%s1417_s1 + $0x1b0] sm:$0xff]  ;;  %v79_v46 = vld [vmem:[%s1417_s1 + $0x1a8] sm:$0xff]  ;;  %v78_v50 = vld [vmem:[%s1417_s1 + $0x1a0] sm:$0xff] }
   0xf   :  { %793 = vmatpush3.msra.mxu1 %v68_v23  ;;  %759 = vmatprep.subr.mxu0 %v51_v24  ;;  %v32_v43 = vld [vmem:[%s1417_s1 + $0x30] sm:$0xff]  ;;  %v31_v47 = vld [vmem:[%s1417_s1 + $0x28] sm:$0xff]  ;;  %v30_v52 = vld [vmem:[%s1417_s1 + $0x20] sm:$0xff] }
  0x10   :  { %794 = vmatprep.subr.mxu1 %v83_v25  ;;  %760 = vmatpush3.msra.mxu0 %v35_v26  ;;  %v64_v44 = vld [vmem:[%s1417_s1 + $0x130] sm:$0xff]  ;;  %v63_v48 = vld [vmem:[%s1417_s1 + $0x128] sm:$0xff]  ;;  %v62_v53 = vld [vmem:[%s1417_s1 + $0x120] sm:$0xff] }
  0x11   :  { %795 = vmatpush3.msra.mxu1 %v67_v27  ;;  %761 = vmatprep.subr.mxu0 %v50_v28  ;;  %v24_v54 = vld [vmem:[%s1416_s0] sm:$0xff]  ;;  %v45_v55 = vld [vmem:[%s1417_s1 + $0x98] sm:$0xff]  ;;  %v44_v60 = vld [vmem:[%s1417_s1 + $0x90] sm:$0xff] }
  0x12   :  { %796 = vmatprep.subr.mxu1 %v82_v29  ;;  %762 = vmatpush3.msra.mxu0 %v34_v33  ;;  %v77_v56 = vld [vmem:[%s1417_s1 + $0x198] sm:$0xff]  ;;  %v156_v57 = vcombine.high %v24_v54, %v24_v54  ;;  %v76_v61 = vld [vmem:[%s1417_s1 + $0x190] sm:$0xff]  ;;  %v163_v62 = vrot.slane %v24_v54, %v1137_v51  ;;  %v43_v2 = vld [vmem:[%s1417_s1 + $0x88] sm:$0xff] }
  0x13   :  { %797 = vmatpush3.msra.mxu1 %v66_v34  ;;  %763 = vmatprep.subr.mxu0 %v49_v35  ;;  %v29_v58 = vld [vmem:[%s1417_s1 + $0x18] sm:$0xff]  ;;  %v28_v63 = vld [vmem:[%s1417_s1 + $0x10] sm:$0xff]  ;;  %v75_v3 = vld [vmem:[%s1417_s1 + $0x188] sm:$0xff] }
  0x14   :  { %798 = vmatprep.subr.mxu1 %v81_v36  ;;  %764 = vmatpush3.msra.mxu0 %v33_v37  ;;  %v61_v59 = vld [vmem:[%s1417_s1 + $0x118] sm:$0xff]  ;;  %v60_v0 = vld [vmem:[%s1417_s1 + $0x110] sm:$0xff]  ;;  %v170_v1 = vrot.slane %v156_v57, %v1137_v51  ;;  %v27_v4 = vld [vmem:[%s1417_s1 + $0x8] sm:$0xff]  ;;  %v171_v8 = vcombine.high %v163_v62, %v163_v62 }
  0x15   :  { %799 = vmatpush3.msra.mxu1 %v65_v38  ;;  %765 = vmatprep.subr.mxu0 %v48_v39  ;;  %v59_v5 = vld [vmem:[%s1417_s1 + $0x108] sm:$0xff]  ;;  %v42_v6 = vld [vmem:[%s1417_s1 + $0x80] sm:$0xff]  ;;  %v121_v12 = vld [vmem:[%s1417_s1 + $0x2f8] sm:$0xff] }
  0x16   :  { %800 = vmatprep.subr.mxu1 %v80_v40  ;;  %766 = vmatpush3.msra.mxu0 %v32_v43  ;;  %v74_v7 = vld [vmem:[%s1417_s1 + $0x180] sm:$0xff]  ;;  %v172_v10 = vcombine.high %v170_v1, %v170_v1  ;;  %v153_v13 = vld [vmem:[%s1417_s1 + $0x3f8] sm:$0xff]  ;;  %v120_v16 = vld [vmem:[%s1417_s1 + $0x2f0] sm:$0xff] }
  0x17   :  { %801 = vmatpush3.msra.mxu1 %v64_v44  ;;  %767 = vmatprep.subr.mxu0 %v47_v45  ;;  %v26_v9 = vld [vmem:[%s1417_s1] sm:$0xff]  ;;  %v105_v14 = vld [vmem:[%s1417_s1 + $0x278] sm:$0xff]  ;;  %v152_v17 = vld [vmem:[%s1417_s1 + $0x3f0] sm:$0xff] }
  0x18   :  { %802 = vmatprep.subr.mxu1 %v79_v46  ;;  %768 = vmatpush3.msra.mxu0 %v31_v47  ;;  %v58_v11 = vld [vmem:[%s1417_s1 + $0x100] sm:$0xff]  ;;  %v137_v15 = vld [vmem:[%s1417_s1 + $0x378] sm:$0xff]  ;;  %v104_v18 = vld [vmem:[%s1417_s1 + $0x270] sm:$0xff] }
  0x19   :  { %803 = vmatpush3.msra.mxu1 %v63_v48  ;;  %769 = vmatprep.subr.mxu0 %v46_v49  ;;  %v136_v19 = vld [vmem:[%s1417_s1 + $0x370] sm:$0xff]  ;;  %v119_v20 = vld [vmem:[%s1417_s1 + $0x2e8] sm:$0xff]  ;;  %v118_v24 = vld [vmem:[%s1417_s1 + $0x2e0] sm:$0xff] }
  0x1a   :  { %804 = vmatprep.subr.mxu1 %v78_v50  ;;  %770 = vmatpush3.msra.mxu0 %v30_v52  ;;  %v151_v21 = vld [vmem:[%s1417_s1 + $0x3e8] sm:$0xff]  ;;  %v150_v25 = vld [vmem:[%s1417_s1 + $0x3e0] sm:$0xff]  ;;  %v117_v28 = vld [vmem:[%s1417_s1 + $0x2d8] sm:$0xff] }
  0x1b   :  { %805 = vmatpush3.msra.mxu1 %v62_v53  ;;  %771 = vmatprep.subr.mxu0 %v45_v55  ;;  %v103_v22 = vld [vmem:[%s1417_s1 + $0x268] sm:$0xff]  ;;  %v102_v26 = vld [vmem:[%s1417_s1 + $0x260] sm:$0xff]  ;;  %v149_v29 = vld [vmem:[%s1417_s1 + $0x3d8] sm:$0xff] }
  0x1c   :  { %806 = vmatprep.subr.mxu1 %v77_v56  ;;  %772 = vmatpush3.msra.mxu0 %v29_v58  ;;  %v135_v23 = vld [vmem:[%s1417_s1 + $0x368] sm:$0xff]  ;;  %v134_v27 = vld [vmem:[%s1417_s1 + $0x360] sm:$0xff]  ;;  %v101_v30 = vld [vmem:[%s1417_s1 + $0x258] sm:$0xff] }
  0x1d   :  { %807 = vmatpush3.msra.mxu1 %v61_v59  ;;  %773 = vmatprep.subr.mxu0 %v44_v60  ;;  %v133_v31 = vld [vmem:[%s1417_s1 + $0x358] sm:$0xff]  ;;  %v116_v32 = vld [vmem:[%s1417_s1 + $0x2d0] sm:$0xff] }
  0x1e   :  { %808 = vmatprep.subr.mxu1 %v76_v61  ;;  %774 = vmatpush3.msra.mxu0 %v28_v63  ;;  %v148_v33 = vld [vmem:[%s1417_s1 + $0x3d0] sm:$0xff] }
  0x1f   :  { %809 = vmatpush3.msra.mxu1 %v60_v0  ;;  %775 = vmatprep.subr.mxu0 %v43_v2  ;;  %v100_v34 = vld [vmem:[%s1417_s1 + $0x250] sm:$0xff] }
  0x20   :  { %810 = vmatprep.subr.mxu1 %v75_v3  ;;  %776 = vmatpush3.msra.mxu0 %v27_v4  ;;  %v132_v35 = vld [vmem:[%s1417_s1 + $0x350] sm:$0xff] }
  0x21   :  { %811 = vmatpush3.msra.mxu1 %v59_v5  ;;  %777 = vmatprep.subr.mxu0 %v42_v6 }
  0x22   :  { %812 = vmatprep.subr.mxu1 %v74_v7  ;;  %778 = vmatpush3.msra.mxu0 %v26_v9 }
  0x23   :  { %262 = vmatprep.mubr.f32.mxu0 %v171_v8  ;;  %813 = vmatpush3.msra.mxu1 %v58_v11 }
  0x24   :  { %332 = vmatprep.mubr.f32.mxu1 %v172_v10  ;;  %263 = vmatmul.mubr.f32.vlgmr.msra.gmra.mxu0 %v163_v62 }
  0x25   :  { %333 = vmatmul.mubr.f32.vlgmr.msra.gmra.mxu1 %v170_v1  ;;  %817 = vmatprep.subr.mxu0 %v121_v12 }
  0x26   :  { %852 = vmatprep.subr.mxu1 %v153_v13  ;;  %818 = vmatpush3.msra.mxu0 %v105_v14 }
  0x27   :  { %853 = vmatpush3.msra.mxu1 %v137_v15  ;;  %819 = vmatprep.subr.mxu0 %v120_v16 }
  0x28   :  { %854 = vmatprep.subr.mxu1 %v152_v17  ;;  %820 = vmatpush3.msra.mxu0 %v104_v18 }
  0x29   :  { %855 = vmatpush3.msra.mxu1 %v136_v19  ;;  %821 = vmatprep.subr.mxu0 %v119_v20 }
  0x2a   :  { %856 = vmatprep.subr.mxu1 %v151_v21  ;;  %822 = vmatpush3.msra.mxu0 %v103_v22 }
  0x2b   :  { %857 = vmatpush3.msra.mxu1 %v135_v23  ;;  %823 = vmatprep.subr.mxu0 %v118_v24 }
  0x2c   :  { %858 = vmatprep.subr.mxu1 %v150_v25  ;;  %824 = vmatpush3.msra.mxu0 %v102_v26 }
  0x2d   :  { %859 = vmatpush3.msra.mxu1 %v134_v27  ;;  %825 = vmatprep.subr.mxu0 %v117_v28 }
  0x2e   :  { %860 = vmatprep.subr.mxu1 %v149_v29 }
  0x2f   :  { %13 = vsyncpa [#allocation5], 0  ;;  %826 = vmatpush3.msra.mxu0 %v101_v30  ;;  %861 = vmatpush3.msra.mxu1 %v133_v31  ;;  %v115_v36 = vld [vmem:[%s1417_s1 + $0x2c8] sm:$0xff]  ;;  %v114_v40 = vld [vmem:[%s1417_s1 + $0x2c0] sm:$0xff]  ;;  %v960_v18 = vmov 0.0   ;;  %vm484_vm0 = vcmask 1043456  }
  0x30   :  { %v147_v37 = vld [vmem:[%s1417_s1 + $0x3c8] sm:$0xff]  ;;  %827 = vmatprep.subr.mxu0 %v116_v32  ;;  %862 = vmatprep.subr.mxu1 %v148_v33  ;;  %v146_v41 = vld [vmem:[%s1417_s1 + $0x3c0] sm:$0xff]  ;;  %v113_v44 = vld [vmem:[%s1417_s1 + $0x2b8] sm:$0xff]  ;;  %vm961_vm1 = vmmov 0   ;;  %vm480_vm2 = vcmask 31744   ;;  %s962_s18 = smov [#allocation2]  }
  0x31   :  { %v99_v38 = vld [vmem:[%s1417_s1 + $0x248] sm:$0xff]  ;;  %828 = vmatpush3.msra.mxu0 %v100_v34  ;;  %863 = vmatpush3.msra.mxu1 %v132_v35  ;;  %v98_v42 = vld [vmem:[%s1417_s1 + $0x240] sm:$0xff]  ;;  %v145_v45 = vld [vmem:[%s1417_s1 + $0x3b8] sm:$0xff]  ;;  %s719_s19 = sshll.u32 %s962_s18, 4  ;;  %s963_s20 = smov [#allocation4]   ;;  %vm636_vm3 = vcmask 25600   ;;  %s720_s19 = int_to_ptr.vmem [resolvable:$true] %s719_s19 }
  0x32   :  { %v131_v39 = vld [vmem:[%s1417_s1 + $0x348] sm:$0xff]  ;;  %829 = vmatprep.subr.mxu0 %v115_v36  ;;  %864 = vmatprep.subr.mxu1 %v147_v37  ;;  %v130_v43 = vld [vmem:[%s1417_s1 + $0x340] sm:$0xff]  ;;  %v97_v46 = vld [vmem:[%s1417_s1 + $0x238] sm:$0xff]  ;;  %s729_s21 = sshll.u32 %s963_s20, 4  ;;  %p920_p1 = scmp.lt.s32.totalorder %s720_s19, %s720_s19  ;;  %s730_s21 = int_to_ptr.vmem [resolvable:$true] %s729_s21 }
  0x33   :  { %830 = vmatpush3.msra.mxu0 %v99_v38  ;;  %865 = vmatpush3.msra.mxu1 %v131_v39  ;;  %v129_v47 = vld [vmem:[%s1417_s1 + $0x338] sm:$0xff]  ;;  %v112_v48 = vld [vmem:[%s1417_s1 + $0x2b0] sm:$0xff]  ;;  %v111_v53 = vld [vmem:[%s1417_s1 + $0x2a8] sm:$0xff] }
  0x34   :  { %831 = vmatprep.subr.mxu0 %v114_v40  ;;  %866 = vmatprep.subr.mxu1 %v146_v41  ;;  %v144_v49 = vld [vmem:[%s1417_s1 + $0x3b0] sm:$0xff]  ;;  %v143_v54 = vld [vmem:[%s1417_s1 + $0x3a8] sm:$0xff]  ;;  %v110_v58 = vld [vmem:[%s1417_s1 + $0x2a0] sm:$0xff] }
  0x35   :  { %832 = vmatpush3.msra.mxu0 %v98_v42  ;;  %867 = vmatpush3.msra.mxu1 %v130_v43  ;;  %v96_v50 = vld [vmem:[%s1417_s1 + $0x230] sm:$0xff]  ;;  %v25_v55 = vld [vmem:[%s1416_s0 + $0x8] sm:$0xff]  ;;  %v142_v59 = vld [vmem:[%s1417_s1 + $0x3a0] sm:$0xff] }
  0x36   :  { %833 = vmatprep.subr.mxu0 %v113_v44  ;;  %868 = vmatprep.subr.mxu1 %v145_v45  ;;  %v128_v52 = vld [vmem:[%s1417_s1 + $0x330] sm:$0xff]  ;;  %v95_v56 = vld [vmem:[%s1417_s1 + $0x228] sm:$0xff]  ;;  %v94_v60 = vld [vmem:[%s1417_s1 + $0x220] sm:$0xff]  ;;  %v173_v62 = vcombine.high %v25_v55, %v25_v55  ;;  %v180_v5 = vrot.slane %v25_v55, %v1137_v51 }
  0x37   :  { %834 = vmatpush3.msra.mxu0 %v97_v46  ;;  %869 = vmatpush3.msra.mxu1 %v129_v47  ;;  %v127_v57 = vld [vmem:[%s1417_s1 + $0x328] sm:$0xff]  ;;  %v126_v61 = vld [vmem:[%s1417_s1 + $0x320] sm:$0xff]  ;;  %v109_v63 = vld [vmem:[%s1417_s1 + $0x298] sm:$0xff] }
  0x38   :  { %835 = vmatprep.subr.mxu0 %v112_v48  ;;  %870 = vmatprep.subr.mxu1 %v144_v49  ;;  %v141_v0 = vld [vmem:[%s1417_s1 + $0x398] sm:$0xff]  ;;  %v108_v3 = vld [vmem:[%s1417_s1 + $0x290] sm:$0xff]  ;;  %v187_v8 = vrot.slane %v173_v62, %v1137_v51  ;;  %v107_v9 = vld [vmem:[%s1417_s1 + $0x288] sm:$0xff]  ;;  %v188_v14 = vcombine.high %v180_v5, %v180_v5 }
  0x39   :  { %836 = vmatpush3.msra.mxu0 %v96_v50  ;;  %871 = vmatpush3.msra.mxu1 %v128_v52  ;;  %v93_v1 = vld [vmem:[%s1417_s1 + $0x218] sm:$0xff]  ;;  %v140_v4 = vld [vmem:[%s1417_s1 + $0x390] sm:$0xff]  ;;  %v139_v10 = vld [vmem:[%s1417_s1 + $0x388] sm:$0xff] }
  0x3a   :  { %837 = vmatprep.subr.mxu0 %v111_v53  ;;  %872 = vmatprep.subr.mxu1 %v143_v54  ;;  %v125_v2 = vld [vmem:[%s1417_s1 + $0x318] sm:$0xff]  ;;  %v92_v6 = vld [vmem:[%s1417_s1 + $0x210] sm:$0xff]  ;;  %v91_v11 = vld [vmem:[%s1417_s1 + $0x208] sm:$0xff]  ;;  %v189_v16 = vcombine.high %v187_v8, %v187_v8 }
  0x3b   :  { %838 = vmatpush3.msra.mxu0 %v95_v56  ;;  %873 = vmatpush3.msra.mxu1 %v127_v57  ;;  %v124_v7 = vld [vmem:[%s1417_s1 + $0x310] sm:$0xff]  ;;  %v123_v51 = vld [vmem:[%s1417_s1 + $0x308] sm:$0xff]  ;;  %v106_v12 = vld [vmem:[%s1417_s1 + $0x280] sm:$0xff] }
  0x3c   :  { %839 = vmatprep.subr.mxu0 %v110_v58  ;;  %874 = vmatprep.subr.mxu1 %v142_v59  ;;  %v138_v13 = vld [vmem:[%s1417_s1 + $0x380] sm:$0xff] }
  0x3d   :  { %840 = vmatpush3.msra.mxu0 %v94_v60  ;;  %875 = vmatpush3.msra.mxu1 %v126_v61  ;;  %v90_v15 = vld [vmem:[%s1417_s1 + $0x200] sm:$0xff] }
  0x3e   :  { %841 = vmatprep.subr.mxu0 %v109_v63  ;;  %876 = vmatprep.subr.mxu1 %v141_v0  ;;  %v122_v17 = vld [vmem:[%s1417_s1 + $0x300] sm:$0xff] }
  0x3f   :  { %842 = vmatpush3.msra.mxu0 %v93_v1  ;;  %877 = vmatpush3.msra.mxu1 %v125_v2  ;;  %v479_v19 = vld [vmem:[%s1418_s2] sm:$0xf] }
  0x40   :  { %843 = vmatprep.subr.mxu0 %v108_v3  ;;  %878 = vmatprep.subr.mxu1 %v140_v4  ;;  %v559_v20 = vld [vmem:[%s1419_s3] sm:$0xf] }
  0x41   :  { %844 = vmatpush3.msra.mxu0 %v92_v6  ;;  %879 = vmatpush3.msra.mxu1 %v124_v7  ;;  %v638_v37 = vld [vmem:[%s1420_s4] sm:$0xf]  ;;  %s915_s4 = scalar_lea.vmem %s720_s19, 32 }
  0x42   :  { %845 = vmatprep.subr.mxu0 %v107_v9  ;;  %880 = vmatprep.subr.mxu1 %v139_v10  ;;  %p916_p0 = scmp.ne.s32.totalorder %s720_s19, %s915_s4  ;;  %p921_p2 = scmp.lt.s32.totalorder %s915_s4, %s915_s4 }
  0x43   :  { %846 = vmatpush3.msra.mxu0 %v91_v11  ;;  %881 = vmatpush3.msra.mxu1 %v123_v51 }
  0x44   :  { %847 = vmatprep.subr.mxu0 %v106_v12  ;;  %882 = vmatprep.subr.mxu1 %v138_v13  ;;  %p922_p3 = por %p921_p2, %p920_p1 }
  0x45   :  { %848 = vmatpush3.msra.mxu0 %v90_v15  ;;  %402 = vmatprep.mubr.f32.mxu0 %v188_v14 }
  0x46   :  { %883 = vmatpush3.msra.mxu1 %v122_v17  ;;  %472 = vmatprep.mubr.f32.mxu1 %v189_v16  ;;  %p923_p4 = pnand %p922_p3, %p916_p0 }
  0x47   :  { %403 = vmatmul.mubr.f32.vlgmr.msra.gmra.mxu0 %v180_v5  ;;  %473 = vmatmul.mubr.f32.vlgmr.msra.gmra.mxu1 %v187_v8 }
  0x48   :  { %893 = vmatprep.subr.mxu0 %v960_v18  ;;  %898 = vmatprep.subr.mxu1 %v960_v18 }
  0x49   :  { %894 = vmatpush3.msk.msra.mxu0 %vm484_vm0, %v479_v19  ;;  %895 = vmatprep.mubr.msk.f32.mxu0 %vm961_vm1, %v960_v18 }
  0x4a   :  { %903 = vmatprep.subr.mxu0 %v960_v18  ;;  %900 = vmatprep.mubr.msk.f32.mxu1 %vm961_vm1, %v960_v18 }
  0x4b   :  { %899 = vmatpush3.msk.msra.mxu1 %vm484_vm0, %v559_v20 }
  0xe4   :  { %v779_v21 = vpop.f32.mrf.mxu0 }
  0xe5   :  { %v814_v22 = vpop.f32.mrf.mxu1 }
  0xe6   :  { %v780_v23 = vpop.f32.mrf.mxu0 }
  0xe7   :  { %v815_v24 = vpop.f32.mrf.mxu1  ;;  %v781_v25 = vadd.f32 %v780_v23, %v779_v21 }
  0xe8   :  { %v816_v26 = vadd.f32 %v815_v24, %v814_v22 }
  0xea   :  { %v335_v31 = vadd.f32 %v816_v26, %v781_v25 }
 0x107   :  { %v849_v27 = vpop.f32.mrf.mxu0  ;;  %v884_v28 = vpop.f32.mrf.mxu1 }
 0x109   :  { %v850_v29 = vpop.f32.mrf.mxu0  ;;  %v885_v30 = vpop.f32.mrf.mxu1 }
 0x10a   :  { %v851_v32 = vadd.f32 %v850_v29, %v849_v27  ;;  %v886_v34 = vadd.f32 %v885_v30, %v884_v28 }
 0x10c   :  { %v405_v33 = vadd.f32 %v851_v32, %v335_v31 }
 0x10e   :  { %v475_v35 = vadd.f32 %v886_v34, %v405_v33 }
 0x110   :  { %v478_v36 = vmax.f32 %v475_v35, 0.0 }
 0x112   :  { %896 = vmatmul.mubr.msk.f32.vlgmr.msra.gmra.mxu0 %vm480_vm2, %v478_v36 }
 0x113   :  { %904 = vmatpush3.msk.msra.mxu0 %vm484_vm0, %v638_v37  ;;  %905 = vmatprep.mubr.msk.f32.mxu0 %vm961_vm1, %v960_v18 }
 0x1d2   :  { %v554_v38 = vpop.f32.mrf.mxu0 }
 0x1d3   :  { %v558_v39 = vmax.f32 %v554_v38, 0.0 }
 0x1d4   :  { %v897_v40 = vpop.f32.mrf.mxu0 }
 0x1d5   :  { %901 = vmatmul.mubr.msk.f32.vlgmr.msra.gmra.mxu1 %vm480_vm2, %v558_v39  ;;  %906 = vmatmul.mubr.msk.f32.vlgmr.msra.gmra.mxu0 %vm480_vm2, %v558_v39 }
 0x295   :  { %v632_v41 = vpop.f32.mrf.mxu1  ;;  %v708_v42 = vpop.f32.mrf.mxu0 }
 0x296   :  { %712 = vst.msk [vmem:[#allocation4] sm:$0x3] %vm636_vm3, %v708_v42  ;;  %637 = vst.msk [vmem:[#allocation2] sm:$0x3] %vm636_vm3, %v632_v41 }
 0x297   :  { %v902_v43 = vpop.f32.mrf.mxu1  ;;  %v907_v44 = vpop.f32.mrf.mxu0 }
 0x298   :  { %926 = shalt.err (!%p923_p4)
}
 0x299   :  { %722 = dma.vmem_to_hbm [thread:$0]  %s720_s19, 32, %s1421_s5, [#allocation3]  }
 0x29a   :  { %s935_s24 = scalar_lea.vmem %s730_s21, 32  ;;  %p940_p6 = scmp.lt.s32.totalorder %s730_s21, %s730_s21 }
 0x29b   :  { %p936_p5 = scmp.ne.s32.totalorder %s730_s21, %s935_s24  ;;  %p941_p7 = scmp.lt.s32.totalorder %s935_s24, %s935_s24 }
 0x29d   :  { %p942_p8 = por %p941_p7, %p940_p6 }
 0x29f   :  { %p943_p9 = pnand %p942_p8, %p936_p5 }
 0x2a1   :  { %946 = shalt.err (!%p943_p9)
}
 0x2a2   :  { %732 = dma.vmem_to_hbm [thread:$0]  %s730_s21, 32, %s1422_s6, [#allocation5]  }
 0x2a3   :  { %955 = dma.done.wait [#allocation3], 32  }
 0x2a4   :  { %956 = vsyncadd [#allocation3], 4294967264 }
 0x2a5   :  { %957 = dma.done.wait [#allocation5], 32  }
 0x2a6   :  { %958 = vsyncadd [#allocation5], 4294967264 }
 0x2a7   :  { %739 = vsyncpa [#allocation3], 1 }
 0x2a8   :  { %740 = vsyncpa [#allocation5], 1 }

</bundles_post_ra>
